<compile_context>
chip_gen: v6e
topology: v6e:2x2x1
jax: 0.10.0
libtpu: 0.0.40
codegen_flags: <defaults>
</compile_context>

<pallas_src>
import functools

import jax
import jax.numpy as jnp
from jax.experimental import pallas as pl
from jax.experimental.pallas import tpu as pltpu


# -----------------------------------------------------------------------------
# Generation-gated budgets
# -----------------------------------------------------------------------------

def _vmem_capacity_bytes() -> int:
    try:
        info = pltpu.get_tpu_info()
        for attr in ("vmem_capacity_bytes", "vmem_bytes", "vmem_size_bytes"):
            v = getattr(info, attr, None)
            if v:
                return int(v)
    except Exception:
        pass
    # Conservative fallback: assume the smaller (v7x-sized) VMEM.
    return 64 * 1024 * 1024


_VMEM_CAP = _vmem_capacity_bytes()
_SMALL_VMEM = _VMEM_CAP <= 64 * 1024 * 1024

if _SMALL_VMEM:
    # v7x: 64 MiB VMEM per TensorCore, 2 TCs -> smaller tiles, prefer even N-tile
    # counts so the "parallel" axis shards evenly across the two cores.
    _WEIGHT_TILE_BUDGET = 10 * 1024 * 1024   # bytes per single bf16 weight buffer
    _VMEM_LIMIT_BYTES = 48 * 1024 * 1024
    _PREFER_EVEN_TILES = True
else:
    # v5e / v6e: 128 MiB VMEM, single TC -> bigger tiles amortize per-step cost.
    _WEIGHT_TILE_BUDGET = 20 * 1024 * 1024
    _VMEM_LIMIT_BYTES = 64 * 1024 * 1024
    _PREFER_EVEN_TILES = False

_MAX_TK = 2048   # reduction tile (rows of W), multiple of 128


def _round_up(x: int, m: int) -> int:
    return ((x + m - 1) // m) * m


def _choose_tiles(K: int, N: int, *, prefer_even_tiles: bool):
    """Pick (tk, tn, K_pad, N_pad) for a (K, N) weight matrix."""
    # Reduction tile: multiple of 128, capped so weight tiles stay small.
    k128 = _round_up(K, 128)
    tk = min(k128, _MAX_TK)
    K_pad = _round_up(K, tk)

    # Output tile: as wide as the VMEM weight budget allows (lane-dense),
    # preferring divisors of the 128-padded N to avoid padding waste, and
    # (on v7x) an even tile count for megacore balance.
    n128 = _round_up(N, 128)
    max_tn = max(128, (_WEIGHT_TILE_BUDGET // (tk * 2)) // 128 * 128)

    if n128 <= max_tn:
        tn = n128
    else:
        best_any = 0
        best_even = 0
        t = max_tn
        while t >= 256:
            if n128 % t == 0:
                if best_any == 0:
                    best_any = t
                if best_even == 0 and (n128 // t) % 2 == 0:
                    best_even = t
                if best_any and best_even:
                    break
            t -= 128
        if prefer_even_tiles and best_even >= max(512, max_tn // 4):
            tn = best_even
        elif best_any >= max(512, max_tn // 2):
            tn = best_any
        else:
            tn = max_tn  # accept N padding; padded columns stay zero

    # Make sure the parallel axis has >= 2 steps (megacore sharding).
    if n128 // tn < 2 and n128 >= 256:
        tn = max(128, (n128 // 2) // 128 * 128)

    N_pad = _round_up(N, tn)
    return tk, tn, K_pad, N_pad


# -----------------------------------------------------------------------------
# Fused Linear(+ReLU) kernel:  y = relu?(x @ W + b)
# -----------------------------------------------------------------------------

def _linear_kernel(x_ref, w_ref, b_ref, o_ref, acc_ref, *, tk: int,
                   apply_relu: bool):
    # x_ref:   (M_pad, K_pad) bf16 activation, resident across the whole grid
    # w_ref:   (tk, tn)       bf16 weight tile (contiguous in HBM)
    # b_ref:   (1, tn)        f32 bias tile
    # o_ref:   (M_pad, tn)    output tile
    # acc_ref: (M_pad, tn)    f32 accumulator (VMEM scratch, resident across k)
    k = pl.program_id(1)

    @pl.when(k == 0)
    def _():
        # Fold the bias into the accumulator init (review #9).
        acc_ref[...] = jnp.broadcast_to(b_ref[...], acc_ref.shape)

    start = pl.multiple_of(k * tk, tk)
    x_blk = x_ref[:, pl.ds(start, tk)]
    acc_ref[...] += jnp.dot(x_blk, w_ref[...],
                            preferred_element_type=jnp.float32)

    @pl.when(k == pl.num_programs(1) - 1)
    def _():
        y = acc_ref[...]
        if apply_relu:
            y = jnp.maximum(y, 0.0)
        o_ref[...] = y.astype(o_ref.dtype)


def pallas_linear(x, w_tiled, b_pad, meta, *, apply_relu: bool, out_dtype):
    """y = relu?(x @ W + b), returning the PADDED (M_pad, N_pad) output.

    x:       (M, Kx) any float dtype; Kx may already be the padded width of the
             previous layer (zero-padded columns), cast to bf16 inside.
    w_tiled: (N_pad//tn, K_pad//tk, tk, tn) bf16, zero-padded, tile-contiguous.
    b_pad:   (1, N_pad) f32, zero-padded.
    """
    K, N, K_pad, N_pad, tk, tn = meta
    M = x.shape[0]
    M_pad = _round_up(max(M, 16), 16)   # full bf16 (16,128) tiles

    x = x.astype(jnp.bfloat16)
    Kx = x.shape[1]
    if Kx > K_pad:
        x = x[:, :K_pad]                # padded-zero columns only
        Kx = K_pad
    if (M_pad - M) or (K_pad - Kx):
        x = jnp.pad(x, ((0, M_pad - M), (0, K_pad - Kx)))

    grid = (N_pad // tn, K_pad // tk)   # (parallel over N tiles, reduction over K)
    kernel = functools.partial(_linear_kernel, tk=tk, apply_relu=apply_relu)

    return pl.pallas_call(
        kernel,
        out_shape=jax.ShapeDtypeStruct((M_pad, N_pad), out_dtype),
        grid_spec=pltpu.PrefetchScalarGridSpec(
            num_scalar_prefetch=0,
            grid=grid,
            in_specs=[
                # Whole padded activation, resident (constant block index).
                pl.BlockSpec((M_pad, K_pad), lambda j, k: (0, 0)),
                # Tile-contiguous weight: one contiguous HBM read per step.
                pl.BlockSpec((None, None, tk, tn), lambda j, k: (j, k, 0, 0)),
                # Bias tile (constant over k).
                pl.BlockSpec((1, tn), lambda j, k: (0, j)),
            ],
            out_specs=pl.BlockSpec((M_pad, tn), lambda j, k: (0, j)),
            scratch_shapes=[pltpu.VMEM((M_pad, tn), jnp.float32)],
        ),
        compiler_params=pltpu.CompilerParams(
            dimension_semantics=("parallel", "arbitrary"),
            vmem_limit_bytes=_VMEM_LIMIT_BYTES,
        ),
    )(x, w_tiled, b_pad)


# -----------------------------------------------------------------------------
# Model: 5 Linear layers, ReLU between all but the last (310 -> H x4 -> 77*768)
# -----------------------------------------------------------------------------

class CLIPPallas:
    """Pallas implementation of the CLIP MLP forward pass."""

    def __init__(self, key, in_dim=310, hidden_dim=10000, out_dim=77 * 768):
        dims = [in_dim, hidden_dim, hidden_dim, hidden_dim, hidden_dim, out_dim]
        self.out_dim = out_dim
        self.layers = []
        keys = jax.random.split(key, len(dims) - 1)
        for i, k in enumerate(keys):
            kw, kb = jax.random.split(k)
            fan_in = dims[i]
            fan_out = dims[i + 1]
            scale = 1.0 / (fan_in ** 0.5)
            w = jax.random.uniform(kw, (fan_in, fan_out), jnp.float32,
                                   minval=-scale, maxval=scale)
            b = jax.random.uniform(kb, (fan_out,), jnp.float32,
                                   minval=-scale, maxval=scale)

            tk, tn, K_pad, N_pad = _choose_tiles(
                fan_in, fan_out, prefer_even_tiles=_PREFER_EVEN_TILES)

            # Zero-pad once at init (padded rows/cols stay zero so chained
            # padded activations are exact), cast weights to bf16, then
            # re-lay them out tile-contiguously: (Nt, Kt, tk, tn).
            w_p = jnp.pad(w, ((0, K_pad - fan_in), (0, N_pad - fan_out))
                          ).astype(jnp.bfloat16)
            Kt, Nt = K_pad // tk, N_pad // tn
            w_tiled = w_p.reshape(Kt, tk, Nt, tn).transpose(2, 0, 1, 3)
            b_p = jnp.pad(b, (0, N_pad - fan_out)).reshape(1, N_pad
                          ).astype(jnp.float32)

            meta = (fan_in, fan_out, K_pad, N_pad, tk, tn)
            self.layers.append((w_tiled, b_p, meta))

    def __call__(self, eeg):
        # eeg: (batch, 310)
        M = eeg.shape[0]
        h = eeg
        n_layers = len(self.layers)
        for i, (w_tiled, b_p, meta) in enumerate(self.layers):
            last = (i == n_layers - 1)
            # Padded activations are chained directly between layers; only the
            # final output is sliced back to logical shape.
            h = pallas_linear(h, w_tiled, b_p, meta,
                              apply_relu=not last,
                              out_dtype=jnp.float32 if last else jnp.bfloat16)
        return h[:M, :self.out_dim]   # (batch, 77*768) f32


# -----------------------------------------------------------------------------
# Self-test
# -----------------------------------------------------------------------------

if __name__ == "__main__":
    key = jax.random.PRNGKey(0)
    k_model, k_data = jax.random.split(key)

    batch = 2
    in_dim = 310
    hidden_dim = 256          # scaled-down stand-in for the 10000-wide hidden layers
    out_dim = 77 * 768        # 59136, exactly as in the PyTorch module

    model = CLIPPallas(k_model, in_dim=in_dim, hidden_dim=hidden_dim,
                       out_dim=out_dim)

    eeg = jax.random.normal(k_data, (batch, in_dim), jnp.float32)

    out = model(eeg)
    out = jax.block_until_ready(out)

    assert out.shape == (batch, out_dim), out.shape
    assert out.dtype == jnp.float32

    # Pure-JAX reference mirroring the kernel's bf16-weight / bf16-activation,
    # f32-accumulation path (un-tile the packed weights back to (K, N)).
    ref = eeg.astype(jnp.bfloat16).astype(jnp.float32)
    n_layers = len(model.layers)
    for i, (w_tiled, b_p, meta) in enumerate(model.layers):
        K, N, K_pad, N_pad, tk, tn = meta
        w_full = w_tiled.transpose(1, 2, 0, 3).reshape(K_pad, N_pad)[:K, :N]
        ref = ref @ w_full.astype(jnp.float32) + b_p[0, :N]
        if i < n_layers - 1:
            ref = jnp.maximum(ref, 0.0)
            ref = ref.astype(jnp.bfloat16).astype(jnp.float32)

    assert jnp.allclose(out, ref, atol=3e-2, rtol=3e-2), float(
        jnp.max(jnp.abs(out - ref)))

    print("KERNEL_OK")
</pallas_src>

<mosaic_0001>
module attributes {stable_mosaic.version = 11 : i64} {
  func.func @_linear_kernel(%arg0: i32, %arg1: i32, %arg2: memref<16x384xbf16, #tpu.memory_space<vmem>>, %arg3: memref<1x1x384x128xbf16, #tpu.memory_space<vmem>>, %arg4: memref<1x128xf32, #tpu.memory_space<vmem>>, %arg5: memref<16x128xbf16, #tpu.memory_space<vmem>>, %arg6: memref<16x128xf32, #tpu.memory_space<vmem>>) attributes {dimension_semantics = [#tpu.dimension_semantics<parallel>, #tpu.dimension_semantics<arbitrary>], iteration_bounds = array<i64: 2, 1>, scalar_prefetch = 0 : i64, scratch_operands = 1 : i64, tpu.core_type = #tpu.core_type<tc>, window_params = [{pipeline_mode = #tpu.pipeline_mode<synchronous>, transform_indices = @transform_0, window_bounds = array<i64: 16, 384>}, {transform_indices = @transform_1, window_bounds = array<i64: 1, 1, 384, 128>}, {transform_indices = @transform_2, window_bounds = array<i64: 1, 128>}, {transform_indices = @transform_3, window_bounds = array<i64: 16, 128>}]} {
    %c0_i32 = arith.constant 0 : i32
    %0 = arith.cmpi eq, %arg1, %c0_i32 : i32
    %1 = arith.extui %0 : i1 to i32
    %c0_i32_0 = arith.constant 0 : i32
    %2 = arith.cmpi ne, %1, %c0_i32_0 : i32
    scf.if %2 {
      %c0_11 = arith.constant 0 : index
      %c0_12 = arith.constant 0 : index
      %16 = vector.load %arg4[%c0_11, %c0_12] : memref<1x128xf32, #tpu.memory_space<vmem>>, vector<1x128xf32>
      %17 = vector.shape_cast %16 : vector<1x128xf32> to vector<1x128xf32>
      %18 = vector.broadcast %17 : vector<1x128xf32> to vector<16x128xf32>
      %c0_13 = arith.constant 0 : index
      %c0_14 = arith.constant 0 : index
      %19 = vector.load %arg6[%c0_13, %c0_14] : memref<16x128xf32, #tpu.memory_space<vmem>>, vector<16x128xf32>
      tpu.vector_store %arg6[%c0_13, %c0_14], %18 {strides = array<i32>} : memref<16x128xf32, #tpu.memory_space<vmem>>, vector<16x128xf32>,
    } else {
    }
    %c384_i32 = arith.constant 384 : i32
    %3 = arith.muli %arg1, %c384_i32 : i32
    %4 = tpu.assume_multiple %3, 384 : i32
    %c0 = arith.constant 0 : index
    %5 = arith.index_cast %4 : i32 to index
    %6 = vector.load %arg2[%c0, %5] : memref<16x384xbf16, #tpu.memory_space<vmem>>, vector<16x384xbf16>
    %c0_1 = arith.constant 0 : index
    %c0_2 = arith.constant 0 : index
    %7 = vector.load %arg6[%c0_1, %c0_2] : memref<16x128xf32, #tpu.memory_space<vmem>>, vector<16x128xf32>
    %c0_3 = arith.constant 0 : index
    %c0_4 = arith.constant 0 : index
    %c0_5 = arith.constant 0 : index
    %c0_6 = arith.constant 0 : index
    %8 = vector.load %arg3[%c0_3, %c0_4, %c0_5, %c0_6] : memref<1x1x384x128xbf16, #tpu.memory_space<vmem>>, vector<1x1x384x128xbf16>
    %9 = vector.shape_cast %8 : vector<1x1x384x128xbf16> to vector<384x128xbf16>
    %cst = arith.constant dense<0.000000e+00> : vector<16x128xf32>
    %10 = tpu.matmul %6, %9, %cst {dimension_numbers = #tpu.dot_dimension_numbers<[1], [0], [0], [1], [0, 0, 1, 1], [], []>} : vector<16x384xbf16>, vector<384x128xbf16>, vector<16x128xf32> -> vector<16x128xf32>
    %11 = arith.addf %7, %10 : vector<16x128xf32>
    %c0_7 = arith.constant 0 : index
    %c0_8 = arith.constant 0 : index
    %12 = vector.load %arg6[%c0_7, %c0_8] : memref<16x128xf32, #tpu.memory_space<vmem>>, vector<16x128xf32>
    tpu.vector_store %arg6[%c0_7, %c0_8], %11 {strides = array<i32>} : memref<16x128xf32, #tpu.memory_space<vmem>>, vector<16x128xf32>,
    %c0_i32_9 = arith.constant 0 : i32
    %13 = arith.cmpi eq, %arg1, %c0_i32_9 : i32
    %14 = arith.extui %13 : i1 to i32
    %c0_i32_10 = arith.constant 0 : i32
    %15 = arith.cmpi ne, %14, %c0_i32_10 : i32
    scf.if %15 {
      %c0_11 = arith.constant 0 : index
      %c0_12 = arith.constant 0 : index
      %16 = vector.load %arg6[%c0_11, %c0_12] : memref<16x128xf32, #tpu.memory_space<vmem>>, vector<16x128xf32>
      %cst_13 = arith.constant 0.000000e+00 : f32
      %17 = vector.broadcast %cst_13 : f32 to vector<16x128xf32>
      %18 = arith.maximumf %16, %17 : vector<16x128xf32>
      %19 = arith.truncf %18 : vector<16x128xf32> to vector<16x128xbf16>
      %c0_14 = arith.constant 0 : index
      %c0_15 = arith.constant 0 : index
      %20 = vector.load %arg5[%c0_14, %c0_15] : memref<16x128xbf16, #tpu.memory_space<vmem>>, vector<16x128xbf16>
      tpu.vector_store %arg5[%c0_14, %c0_15], %19 {strides = array<i32>} : memref<16x128xbf16, #tpu.memory_space<vmem>>, vector<16x128xbf16>,
    } else {
    }
    return
  }
  func.func @transform_0(%arg0: i32, %arg1: i32) -> (i32, i32) {
    %c0_i32 = arith.constant 0 : i32
    %c0_i32_0 = arith.constant 0 : i32
    %c0_i32_1 = arith.constant 0 : i32
    return %c0_i32, %c0_i32_0 : i32, i32
  }
  func.func @transform_1(%arg0: i32, %arg1: i32) -> (i32, i32, i32, i32) {
    %c0_i32 = arith.constant 0 : i32
    %c0_i32_0 = arith.constant 0 : i32
    %c0_i32_1 = arith.constant 0 : i32
    return %arg0, %arg1, %c0_i32, %c0_i32_0 : i32, i32, i32, i32
  }
  func.func @transform_2(%arg0: i32, %arg1: i32) -> (i32, i32) {
    %c0_i32 = arith.constant 0 : i32
    %c0_i32_0 = arith.constant 0 : i32
    return %c0_i32, %arg0 : i32, i32
  }
  func.func @transform_3(%arg0: i32, %arg1: i32) -> (i32, i32) {
    %c0_i32 = arith.constant 0 : i32
    %c0_i32_0 = arith.constant 0 : i32
    return %c0_i32, %arg0 : i32, i32
  }
}

</mosaic_0001>

<bundles_post_ra>
// kernel: tpu_custom_call.1
= control target key start
LH: loop header
LB: loop body
LE: loop exit
PB: predicated region body
PF: predicated region fallthrough
CT: control target
= control target key end

     0   :  { %8 = vsyncpa [#allocation4], 0  ;;  %s1283_s0 = inlined_call_operand.hbm [shape: bf16[16,384], index: 0, kind: input, shape index: {}]   ;;  %s1284_s1 = inlined_call_operand.hbm [shape: bf16[2,1,384,128], index: 1, kind: input, shape index: {}]   ;;  %s1285_s2 = inlined_call_operand.vmem [shape: f32[1,256], index: 2, kind: input, shape index: {}]   ;;  %s1286_s3 = inlined_call_operand.hbm [shape: bf16[16,256], index: 3, kind: output, shape index: {}]  }
   0x1   :  { %9 = vsyncpa [#allocation7], 0 }
   0x2   :  { %11 = vsyncpa [#allocation7 + $0x1], 0 }
   0x3   :  { %12 = vsyncpa [#allocation5], 0 }
   0x4   :  { %14 = vsyncpa [#allocation5 + $0x1], 0  ;;  %s1076_s12 = smov 0   ;;  %s1078_s13 = smov 0  }
   0x5   :  { %s1080_s14 = smov 0   ;;  %s1082_s15 = smov 0  }
   0x6   :  { %s1084_s16 = smov 0   ;;  %s1086_s17 = smov 0  }
   0x7 LB: > { %s690_s18 = sadd.s32 4294967295, %s1042_s17   ;;  %s691_s19 = sadd.s32 4294967294, %s1042_s17   ;;  %s1042_s17 = sphi %s1086_s17, %s20_s17   ;;  %s1038_s16 = sphi %s1084_s16, %s1302_s16   ;;  %s1034_s15 = sphi %s1082_s15, %s1301_s15   ;;  %s1030_s14 = sphi %s1080_s14, %s1300_s14   ;;  %s1026_s13 = sphi %s1078_s13, %s1299_s13   ;;  %s1022_s12 = sphi %s1076_s12, %s1298_s12  }
   0x8   : > { %p75_p0 = scmp.ne.s32.totalorder %s1026_s13, %s1022_s12  ;;  %p1110_p1 = scmp.eq.s32.totalorder %s690_s18, 0 }
   0x9   : > { %p1114_p2 = scmp.eq.s32.totalorder %s690_s18, 1  ;;  %p131_p3 = scmp.eq.s32.totalorder %s691_s19, 1 }
   0xa   : > { %p1120_p4 = por %p1110_p1, %p75_p0  ;;  %p692_p5 = scmp.ge.s32.totalorder %s1042_s17, 1 }
   0xb   : > { %p1125_p6 = por %p131_p3, %p75_p0  ;;  %p138_p7 = scmp.lt.s32.totalorder %s1042_s17, 3 }
   0xc   : > { %s1290_s22 = scalar_select %p1120_p4, 1, 0 }
   0xd   : > { %s1291_s23 = scalar_select %p1125_p6, 1, 0 }
   0xe   : > { %p1130_p8 = pnand %p692_p5, %p138_p7  ;;  %s1044_s25 = smov [#allocation3]  }
   0xf   : > { %s150_s26 = sshll.u32 %s1044_s25, 4  ;;  %p694_p10 = scmp.ge.s32.totalorder %s1042_s17, 2  ;;  %s151_s26 = int_to_ptr.vmem [resolvable:$true] %s150_s26 }
  0x10   : > { %p802_p9 = pneg %p1130_p8  ;;  %s32_s28 = sadd.s32 1, %s1038_s16 }
  0x11   : > { %s915_s29 = scalar_lea.vmem %s151_s26, 384  ;;  %p923_p5 = scmp.lt.s32.totalorder %s151_s26, %s151_s26 }
  0x12   : > { %p1139_p11 = pnand %p802_p9, %p1110_p1  ;;  %p916_p13 = scmp.ne.s32.totalorder %s151_s26, %s915_s29 }
  0x13   : > { %p924_p7 = scmp.lt.s32.totalorder %s915_s29, %s915_s29 }
  0x14   : > { %p906_p12 = pneg %p1139_p11 }
  0x15   : > { %p925_p6 = por %p924_p7, %p923_p5 }
  0x16   : > { %p918_p0 = pnand %p916_p13, %p906_p12 }
  0x18   : > { %p919_p3 = pneg %p918_p0 }
  0x1a   : > { %p926_p4 = pnand %p925_p6, %p919_p3 }
  0x1c   : > { %929 = shalt.err (!%p926_p4)
}
  0x1d   : > { %s1045_s30 = smov 192   ;;  %s1046_s4 = smov 12  }
  0x1e   : > { %805 = dma.hbm_to_vmem [thread:$0]  (!%p1139_p11), %s1283_s0, 384, %s151_s26, [#allocation4], %s1045_s30, %s1045_s30, %s1046_s4  }
  0x1f   : > { %p34_p6 = scmp.ge.s32.totalorder %s32_s28, 2  ;;  %s62_s7 = sadd.s32 1, %s1030_s14 }
  0x20   : > { %p69_p4 = scmp.ne.s32.totalorder %s1030_s14, %s1026_s13  ;;  %p70_p9 = scmp.eq.s32.totalorder %s1042_s17, 0 }
  0x21   : > { %s1304_s28 = smov (%p34_p6, %s32_s28), 0  ;;  %p815_p0 = scmp.lt.s32.totalorder %s1042_s17, 2 }
  0x22   : > { %p71_p12 = por %p70_p9, %p69_p4  ;;  %p1159_p13 = por %p1114_p2, %p69_p4 }
  0x23   : > { %s57_s9 = ssub.s32 %s1038_s16, %s1304_s28  ;;  %s164_s10 = sand.u32 1, %s1030_s14  }
  0x24   : > { %p60_p3 = scmp.eq.s32.totalorder %s57_s9, 0  ;;  %s791_s11 = smul.u32 192, %s164_s10 }
  0x25   : > { %s792_s19 = smul.u32 3072, %s1038_s16  ;;  %p1171_p11 = pnand %p815_p0, %p71_p12 }
  0x26   : > { %s1168_s18 = scalar_select %p60_p3, %s1030_s14, %s62_s7  }
  0x27   : > { %s168_s25 = scalar_lea.vmem [#allocation6], %s791_s11  ;;  %s176_s30 = scalar_lea.hbm %s1284_s1, %s792_s19 }
  0x28   : > { %s177_s26 = sshll.u32 %s168_s25, 4  ;;  %s165_s4 = scalar_lea.sflag [#allocation7], %s164_s10  ;;  %s178_s26 = int_to_ptr.vmem [resolvable:$true] %s177_s26 }
  0x29   : > { %p932_p2 = pneg %p1171_p11  ;;  %s943_s5 = scalar_lea.vmem %s178_s26, 3072 }
  0x2a   : > { %p944_p5 = scmp.ne.s32.totalorder %s178_s26, %s943_s5  ;;  %s1047_s6 = smov [#allocation6]  }
  0x2b   : > { %s948_s7 = sshll.u32 %s1047_s6, 4  ;;  %s949_s7 = int_to_ptr.vmem [resolvable:$false] %s948_s7 }
  0x2c   : > { %p946_p7 = pnand %p944_p5, %p932_p2  ;;  %s950_s9 = scalar_lea.vmem %s949_s7, 6144 }
  0x2d   : > { %p951_p4 = scmp.lt.s32.totalorder %s178_s26, %s949_s7  ;;  %p952_p9 = scmp.lt.s32.totalorder %s950_s9, %s943_s5 }
  0x2e   : > { %p947_p6 = pneg %p946_p7 }
  0x2f   : > { %p953_p12 = por %p952_p9, %p951_p4 }
  0x31   : > { %p954_p0 = pnand %p953_p12, %p947_p6 }
  0x33   : > { %957 = shalt.err (!%p954_p0)
}
  0x34   : > { %s1048_s11 = smov 64   ;;  %s1049_s19 = smov 4  }
  0x35   : > { %809 = dma.hbm_to_vmem [thread:$0]  (!%p1171_p11), %s176_s30, 3072, %s178_s26, %s165_s4, %s1048_s11, %s1048_s11, %s1049_s19  }
  0x36   : > { %195 = sbr.rel (%p1130_p8) target bundleno = 323 (0x143), region = 32 }
  0x3b   : > { %1009 = dma.done.wait (%p1110_p1), [#allocation4], 384  }
  0x3c   : > { %1011 = vsyncadd (%p1110_p1), [#allocation4], 4294966912  ;;  %s1189_s10 = sand.u32 1, %s1026_s13   ;;  %p1296_p3 = scmp.ne.s32.totalorder %s1290_s22, 0 }
  0x3d   : > { %s793_s25 = smul.u32 192, %s1189_s10  ;;  %s202_s29 = scalar_lea.sflag [#allocation7], %s1189_s10 }
  0x3f   : > { %s1193_s21 = scalar_lea.vmem [#allocation6], %s793_s25 }
  0x40   : > { %1013 = dma.done.wait (%p1296_p3), %s202_s29, 3072  }
  0x41   : > { %1015 = vsyncadd (%p1296_p3), %s202_s29, 4294964224  ;;  %v1050_v0 = vmov 0.0   ;;  %vm1051_vm0 = vmmov 0   ;;  %v876_v1 = vld [vmem:[%s1193_s21 + $0x78] sm:$0xff]   ;;  %v879_v4 = vld [vmem:[%s1193_s21 + $0x70] sm:$0xff]   ;;  %p231_p1 = scmp.lt.s32.totalorder %s1034_s15, 1 }
  0x42   : > { %771 = vmatprep.subr.bf16.mxu1 %v1050_v0  ;;  %787 = vmatprep.mubr.msk.bf16.mxu1 %vm1051_vm0, %v1050_v0  ;;  %v877_v2 = vld [vmem:[%s1193_s21 + $0xb8] sm:$0xff]   ;;  %v880_v5 = vld [vmem:[%s1193_s21 + $0xb0] sm:$0xff]   ;;  %v882_v7 = vld [vmem:[%s1193_s21 + $0x68] sm:$0xff]   ;;  %s698_s27 = sshll.u32 %s1189_s10, 3  ;;  %s730_s5 = sshll.u32 %s1034_s15, 6 }
  0x43   : > { %740 = vmatprep.subr.bf16.mxu0 %v876_v1  ;;  %v878_v3 = vld [vmem:[%s1193_s21 + $0x38] sm:$0xff]   ;;  %772 = vmatpush3.bf16.msra.mxu1 %v877_v2  ;;  %v881_v6 = vld [vmem:[%s1193_s21 + $0x30] sm:$0xff]   ;;  %v883_v8 = vld [vmem:[%s1193_s21 + $0xa8] sm:$0xff]   ;;  %s232_s20 = scalar_select %p231_p1, %s1034_s15, 1 }
  0x44   : > { %741 = vmatpush3.bf16.msra.mxu0 %v878_v3  ;;  %773 = vmatprep.subr.bf16.mxu1 %v1050_v0  ;;  %v884_v9 = vld [vmem:[%s1193_s21 + $0x28] sm:$0xff]   ;;  %v885_v10 = vld [vmem:[%s1193_s21 + $0x60] sm:$0xff]   ;;  %v888_v13 = vld [vmem:[%s1193_s21 + $0x58] sm:$0xff]   ;;  %s230_s30 = scalar_lea.vmem [#allocation8], %s698_s27  ;;  %s1235_s9 = scalar_lea.hbm %s1286_s3, %s730_s5 }
  0x45   : > { %742 = vmatprep.subr.bf16.mxu0 %v879_v4  ;;  %v886_v11 = vld [vmem:[%s1193_s21 + $0xa0] sm:$0xff]   ;;  %v889_v14 = vld [vmem:[%s1193_s21 + $0x98] sm:$0xff]   ;;  %v891_v16 = vld [vmem:[%s1193_s21 + $0x50] sm:$0xff]   ;;  %s233_s26 = scalar_lea.vmem %s1285_s2, %s232_s20  ;;  %s583_s4 = sshll.u32 %s230_s30, 4  ;;  %s1230_s4 = int_to_ptr.vmem [resolvable:$true] %s583_s4 }
  0x46   : > { %v887_v12 = vld [vmem:[%s1193_s21 + $0x20] sm:$0xff]   ;;  %v890_v15 = vld [vmem:[%s1193_s21 + $0x18] sm:$0xff]   ;;  %v892_v17 = vld [vmem:[%s1193_s21 + $0x90] sm:$0xff]   ;;  %s571_s11 = scalar_lea.sflag [#allocation5], %s1189_s10  ;;  %s958_s19 = scalar_lea.vmem %s1230_s4, 128 }
  0x47   : > { %774 = vmatpush3.bf16.msra.mxu1 %v880_v5  ;;  %v893_v18 = vld [vmem:[%s1193_s21 + $0x10] sm:$0xff]   ;;  %v894_v19 = vld [vmem:[%s1193_s21 + $0x48] sm:$0xff]   ;;  %v897_v22 = vld [vmem:[%s1193_s21 + $0x40] sm:$0xff]   ;;  %p959_p8 = scmp.ne.s32.totalorder %s1230_s4, %s958_s19  ;;  %s1052_s15 = smov [#allocation8]  }
  0x48   : > { %743 = vmatpush3.bf16.msra.mxu0 %v881_v6  ;;  %775 = vmatprep.subr.bf16.mxu1 %v1050_v0  ;;  %v895_v20 = vld [vmem:[%s1193_s21 + $0x88] sm:$0xff]   ;;  %v898_v24 = vld [vmem:[%s1193_s21 + $0x80] sm:$0xff]   ;;  %v903_v26 = vld [vmem:[#allocation3 + $0x8] ss:$12 sps:$4 sm:$0xff]   ;;  %s962_s25 = sshll.u32 %s1052_s15, 4  ;;  %s963_s25 = int_to_ptr.vmem [resolvable:$false] %s962_s25 }
  0x49   : > { %744 = vmatprep.subr.bf16.mxu0 %v882_v7  ;;  %v896_v21 = vld [vmem:[%s1193_s21 + $0x8] sm:$0xff]   ;;  %v899_v25 = vld [vmem:[%s1193_s21] sm:$0xff]   ;;  %p960_p11 = pnand %p959_p8, %p1159_p13  ;;  %s964_s29 = scalar_lea.vmem %s963_s25, 256 }
  0x4a   : > { %v902_v23 = vld [vmem:[#allocation3 + $0x4] ss:$12 sps:$4 sm:$0xff]   ;;  %v900_v27 = vld [vmem:[#allocation3] ss:$12 sps:$4 sm:$0xff]   ;;  %p965_p5 = scmp.lt.s32.totalorder %s1230_s4, %s963_s25  ;;  %p966_p7 = scmp.lt.s32.totalorder %s964_s29, %s958_s19 }
  0x4b   : > { %776 = vmatpush3.bf16.msra.mxu1 %v883_v8  ;;  %499 = vmatprep.mubr.bf16.mxu0 %v902_v23  ;;  %v699_v37 = vld [vmem:[%s233_s26] ss:$0 sm:$0xff]  ;;  %p961_p2 = pneg %p960_p11 }
  0x4c   : > { %745 = vmatpush3.bf16.msra.mxu0 %v884_v9  ;;  %777 = vmatprep.subr.bf16.mxu1 %v1050_v0  ;;  %p967_p6 = por %p966_p7, %p965_p5 }
  0x4d   : > { %746 = vmatprep.subr.bf16.mxu0 %v885_v10 }
  0x4e   : > { %p968_p4 = pnand %p967_p6, %p961_p2 }
  0x4f   : > { %778 = vmatpush3.bf16.msra.mxu1 %v886_v11 }
  0x50   : > { %747 = vmatpush3.bf16.msra.mxu0 %v887_v12  ;;  %779 = vmatprep.subr.bf16.mxu1 %v1050_v0 }
  0x51   : > { %748 = vmatprep.subr.bf16.mxu0 %v888_v13 }
  0x53   : > { %780 = vmatpush3.bf16.msra.mxu1 %v889_v14 }
  0x54   : > { %749 = vmatpush3.bf16.msra.mxu0 %v890_v15  ;;  %781 = vmatprep.subr.bf16.mxu1 %v1050_v0 }
  0x55   : > { %750 = vmatprep.subr.bf16.mxu0 %v891_v16 }
  0x57   : > { %782 = vmatpush3.bf16.msra.mxu1 %v892_v17 }
  0x58   : > { %751 = vmatpush3.bf16.msra.mxu0 %v893_v18  ;;  %783 = vmatprep.subr.bf16.mxu1 %v1050_v0 }
  0x59   : > { %752 = vmatprep.subr.bf16.mxu0 %v894_v19 }
  0x5b   : > { %784 = vmatpush3.bf16.msra.mxu1 %v895_v20 }
  0x5c   : > { %753 = vmatpush3.bf16.msra.mxu0 %v896_v21  ;;  %785 = vmatprep.subr.bf16.mxu1 %v1050_v0 }
  0x5d   : > { %754 = vmatprep.subr.bf16.mxu0 %v897_v22 }
  0x5f   : > { %786 = vmatpush3.bf16.msra.mxu1 %v898_v24 }
  0x60   : > { %755 = vmatpush3.bf16.msra.mxu0 %v899_v25 }
  0x62   : > { %788 = vmatmul.mubr.bf16.vlgmr.msra.gmra.mxu1 %v903_v26 }
  0x63   : > { %500 = vmatmul.mubr.bf16.vlgmr.msra.gmra.mxu0 %v900_v27 }
 0x122   : > { %v542_v28 = vpop.f32.mrf.mxu1 }
 0x123   : > { %v756_v29 = vpop.f32.mrf.mxu0 }
 0x124   : > { %v789_v30 = vpop.f32.mrf.mxu1 }
 0x125   : > { %v757_v31 = vpop.f32.mrf.mxu0 }
 0x126   : > { %v758_v32 = vadd.f32 %v757_v31, %v756_v29  ;;  %v545_v33 = vpop.f32.mrf.mxu1 }
 0x127   : > { %v759_v34 = vpop.f32.mrf.mxu0 }
 0x128   : > { %v543_v35 = vadd.f32 %v758_v32, %v542_v28  ;;  %v790_v36 = vpop.f32.mrf.mxu1 }
 0x129   : > { %v760_v38 = vpop.f32.mrf.mxu0 }
 0x12a   : > { %v761_v39 = vadd.f32 %v760_v38, %v759_v34  ;;  %v549_v40 = vadd.f32 %v699_v37, %v543_v35 }
 0x12c   : > { %v546_v41 = vadd.f32 %v761_v39, %v545_v33  ;;  %v558_v43 = vmax.f32 %v549_v40, 0.0 }
 0x12e   : > { %v550_v42 = vadd.f32 %v699_v37, %v546_v41 }
 0x130   : > { %v559_v44 = vmax.f32 %v550_v42, 0.0 }
 0x132   : > { %v738_v45 = vpack.c.bf16 %v559_v44, %v558_v43 }
 0x134   : > { %739 = vst [vmem:[%s230_s30] sm:$0xff] %v738_v45  }
 0x135   : > { %971 = shalt.err (!%p968_p4)
}
 0x136   : > { %s972_s21 = scalar_lea.hbm %s1235_s9, 128  ;;  %s976_s24 = scalar_lea.hbm %s1286_s3, 256 }
 0x137   : > { %p973_p9 = scmp.ne.s32.totalorder %s1235_s9, %s972_s21  ;;  %p977_p3 = scmp.lt.s32.totalorder %s1235_s9, %s1286_s3 }
 0x138   : > { %p978_p1 = scmp.lt.s32.totalorder %s976_s24, %s972_s21 }
 0x139   : > { %p974_p12 = pnand %p973_p9, %p1159_p13 }
 0x13a   : > { %p979_p8 = por %p978_p1, %p977_p3 }
 0x13b   : > { %p975_p0 = pneg %p974_p12 }
 0x13d   : > { %p980_p11 = pnand %p979_p8, %p975_p0 }
 0x13f   : > { %983 = shalt.err (!%p980_p11)
}
 0x140   : > { %s1053_s30 = smov 64   ;;  %s1054_s5 = smov 128  }
 0x141   : > { %s1055_s6 = smov 4  }
 0x142   : > { %800 = dma.vmem_to_hbm [thread:$0]  (%p1159_p13), %s1230_s4, 128, %s1235_s9, %s571_s11, %s1053_s30, %s1054_s5, %s1055_s6  }
 0x143 PF: > { %s598_s7 = sand.u32 1, %s1022_s12   ;;  %p1297_p2 = scmp.ne.s32.totalorder %s1291_s23, 0 }
 0x144   : > { %s599_s19 = scalar_lea.sflag [#allocation5], %s598_s7 }
 0x145   : > { %p811_p5 = pnand %p694_p10, %p1297_p2 }
 0x147   : > { %p812_p7 = pneg %p811_p5 }
 0x149   : > { %1017 = dma.done.wait (%p812_p7), %s599_s19, 128  }
 0x14a   : > { %1019 = vsyncadd (%p812_p7), %s599_s19, 4294967168  ;;  %s20_s17 = sadd.s32 1, %s1042_s17   ;;  %s1298_s12 = smov %s1026_s13 }
 0x14b   : > { %p17_p6 = scmp.ge.s32.totalorder %s20_s17, 4   ;;  %s1299_s13 = smov %s1030_s14 }
 0x14c   : > { %s1300_s14 = smov %s1168_s18  ;;  %s1301_s15 = smov %s1038_s16 }
 0x14d   : > { %s1302_s16 = smov %s1304_s28  ;;  %19 = sbr.rel (!%p17_p6) target bundleno = 7 (0x7), region = 94 }
 0x152   :  { %604 = vsyncpa [#allocation4], 1 }
 0x153   :  { %606 = vsyncpa [#allocation4 + $0x1], 1 }
 0x154   :  { %607 = vsyncpa [#allocation7], 1 }
 0x155   :  { %609 = vsyncpa [#allocation7 + $0x1], 1 }
 0x156   :  { %610 = vsyncpa [#allocation5], 1 }
 0x157   :  { %612 = vsyncpa [#allocation5 + $0x1], 1 }

</bundles_post_ra>
